<compile_context>
chip_gen: v6e
topology: v6e:2x2x1
jax: 0.10.0
libtpu: 0.0.40
codegen_flags: <defaults>
</compile_context>

<pallas_src>
import jax
import jax.numpy as jnp
from jax.experimental import pallas as pl
from jax.experimental.pallas import tpu as pltpu


def mlp_kernel(x_ref, w_ref, b_ref, o_ref):
    # x_ref: (TB, 784) f32   w_ref: (784, 10) bf16   b_ref: (1, 10) f32
    # o_ref: (TB, 10) f32
    x = x_ref[...].astype(jnp.bfloat16)  # single-pass bf16 MXU, f32 accumulate
    logits = jnp.dot(x, w_ref[...], preferred_element_type=jnp.float32) + b_ref[...]

    # log_softmax over dim=1 (numerically stable): one exp + one log per element.
    m = jnp.max(logits, axis=-1, keepdims=True)
    s = logits - m
    lse = jnp.log(jnp.sum(jnp.exp(s), axis=-1, keepdims=True))
    o_ref[...] = (s - lse).astype(o_ref.dtype)


def _round_up(n, m):
    return ((n + m - 1) // m) * m


def _pick_tile(n, tb):
    """Batch tile: multiple of 8; when n > 8, force >= 2 roughly balanced tiles
    so the 'parallel' batch axis feeds both v7x TensorCores (no-op on v5e/v6e)."""
    if n <= 8:
        return 8
    return max(8, min(tb, _round_up(pl.cdiv(n, 2), 8)))


def mlp_forward(x, w1, w2, w3, b3, *, tb=1024):
    """x: (N, 784) float32. Weights in [in, out] layout (transposed vs torch),
    b3: (10,). tb: batch tile (1024 default; 2048 is also fine on v7x)."""
    n, d_in = x.shape
    assert d_in == 784

    # No nonlinearity between the three Linears -> algebraically identical to a
    # single 784x10 matmul. Fuse in f32, store bf16 for the MXU.
    w_fused = ((w1 @ w2) @ w3).astype(jnp.bfloat16)
    b3_2d = b3.reshape(1, -1).astype(jnp.float32)

    tb = _pick_tile(n, tb)
    num_tiles = pl.cdiv(n, tb)  # ragged n handled by Pallas partial-block masking

    ce = pl.CostEstimate(
        flops=2 * n * 784 * 10,
        transcendentals=11 * n,  # exp per logit + log per row
        bytes_accessed=n * 784 * 4 + 784 * 10 * 2 + 40 + n * 10 * 4,
    )

    return pl.pallas_call(
        mlp_kernel,
        out_shape=jax.ShapeDtypeStruct((n, 10), jnp.float32),
        grid_spec=pltpu.PrefetchScalarGridSpec(
            num_scalar_prefetch=0,
            grid=(num_tiles,),
            in_specs=[
                pl.BlockSpec((tb, 784), lambda i: (i, 0)),  # x tile over batch
                pl.BlockSpec((784, 10), lambda i: (0, 0)),  # fused weight (resident)
                pl.BlockSpec((1, 10), lambda i: (0, 0)),    # bias (resident)
            ],
            out_specs=pl.BlockSpec((tb, 10), lambda i: (i, 0)),
        ),
        compiler_params=pltpu.CompilerParams(
            # Batch axis is independent -> shards across v7x's two TensorCores.
            dimension_semantics=("parallel",),
        ),
        cost_estimate=ce,
    )(x, w_fused, b3_2d)


def init_params(key):
    """Deterministic synthetic parameters with PyTorch nn.Linear shapes,
    returned already transposed to [in, out] for the kernel."""
    k1, k2, k3, k4 = jax.random.split(key, 4)
    # torch weight shapes: (30,784), (20,30), (10,20); bias (10,)
    w1_t = jax.random.uniform(k1, (30, 784), jnp.float32, -1.0, 1.0) * (1.0 / jnp.sqrt(784.0))
    w2_t = jax.random.uniform(k2, (20, 30), jnp.float32, -1.0, 1.0) * (1.0 / jnp.sqrt(30.0))
    w3_t = jax.random.uniform(k3, (10, 20), jnp.float32, -1.0, 1.0) * (1.0 / jnp.sqrt(20.0))
    b3 = jax.random.uniform(k4, (10,), jnp.float32, -1.0, 1.0) * (1.0 / jnp.sqrt(20.0))
    return w1_t.T, w2_t.T, w3_t.T, b3


def reference_forward(x, w1, w2, w3, b3):
    # Full-precision three-matmul reference (matches torch forward).
    h = x @ w1
    h = h @ w2
    h = h @ w3 + b3
    return jax.nn.log_softmax(h, axis=1)


if __name__ == "__main__":
    key = jax.random.PRNGKey(0)
    kx, kx2, kp = jax.random.split(key, 3)

    w1, w2, w3, b3 = init_params(kp)

    # MNIST-like input: (N, 1, 28, 28) -> view(-1, 784)
    x_img = jax.random.normal(kx, (8, 1, 28, 28), jnp.float32)
    x = x_img.reshape(-1, 784)

    out = jax.block_until_ready(mlp_forward(x, w1, w2, w3, b3))
    ref = reference_forward(x, w1, w2, w3, b3)
    assert out.shape == (8, 10)
    # bf16 MXU operands + fused weight: relaxed (but tight) tolerance vs f32 ref.
    assert jnp.allclose(out, ref, atol=5e-3, rtol=1e-3), "mismatch vs reference (batch=8)"

    # Ragged batch (not a multiple of the tile) exercises the partial-block path
    # and the >=2-tile split (tb becomes 32 -> tiles of 32 and 18).
    x2 = jax.random.normal(kx2, (50, 784), jnp.float32)
    out2 = jax.block_until_ready(mlp_forward(x2, w1, w2, w3, b3))
    ref2 = reference_forward(x2, w1, w2, w3, b3)
    assert out2.shape == (50, 10)
    assert jnp.allclose(out2, ref2, atol=5e-3, rtol=1e-3), "mismatch vs reference (batch=50)"
    assert bool(jnp.all(jnp.isfinite(out2))), "non-finite values leaked into valid rows"

    print("KERNEL_OK")
</pallas_src>

<mosaic_0001>
module attributes {stable_mosaic.version = 11 : i64} {
  func.func @mlp_kernel(%arg0: i32, %arg1: memref<8x784xf32, #tpu.memory_space<vmem>>, %arg2: memref<784x10xbf16, #tpu.memory_space<vmem>>, %arg3: memref<1x10xf32, #tpu.memory_space<vmem>>, %arg4: memref<8x10xf32, #tpu.memory_space<vmem>>) attributes {dimension_semantics = [#tpu.dimension_semantics<parallel>], iteration_bounds = array<i64: 1>, scalar_prefetch = 0 : i64, scratch_operands = 0 : i64, tpu.core_type = #tpu.core_type<tc>, window_params = [{transform_indices = @transform_0, window_bounds = array<i64: 8, 784>}, {pipeline_mode = #tpu.pipeline_mode<synchronous>, transform_indices = @transform_1, window_bounds = array<i64: 784, 10>}, {pipeline_mode = #tpu.pipeline_mode<synchronous>, transform_indices = @transform_2, window_bounds = array<i64: 1, 10>}, {transform_indices = @transform_3, window_bounds = array<i64: 8, 10>}]} {
    %c0 = arith.constant 0 : index
    %c0_0 = arith.constant 0 : index
    %0 = vector.load %arg1[%c0, %c0_0] : memref<8x784xf32, #tpu.memory_space<vmem>>, vector<8x784xf32>
    %1 = arith.truncf %0 : vector<8x784xf32> to vector<8x784xbf16>
    %c0_1 = arith.constant 0 : index
    %c0_2 = arith.constant 0 : index
    %2 = vector.load %arg2[%c0_1, %c0_2] : memref<784x10xbf16, #tpu.memory_space<vmem>>, vector<784x10xbf16>
    %cst = arith.constant dense<0.000000e+00> : vector<8x10xf32>
    %3 = tpu.matmul %1, %2, %cst {dimension_numbers = #tpu.dot_dimension_numbers<[1], [0], [0], [1], [0, 0, 1, 1], [], []>} : vector<8x784xbf16>, vector<784x10xbf16>, vector<8x10xf32> -> vector<8x10xf32>
    %c0_3 = arith.constant 0 : index
    %c0_4 = arith.constant 0 : index
    %4 = vector.load %arg3[%c0_3, %c0_4] : memref<1x10xf32, #tpu.memory_space<vmem>>, vector<1x10xf32>
    %5 = vector.broadcast %4 : vector<1x10xf32> to vector<8x10xf32>
    %6 = arith.addf %3, %5 : vector<8x10xf32>
    %cst_5 = arith.constant dense<0xFF800000> : vector<8xf32>
    %7 = vector.multi_reduction <maximumf>, %6, %cst_5 [1] : vector<8x10xf32> to vector<8xf32>
    %8 = vector.shape_cast %7 : vector<8xf32> to vector<8x1xf32>
    %9 = vector.broadcast %8 : vector<8x1xf32> to vector<8x10xf32>
    %10 = arith.subf %6, %9 : vector<8x10xf32>
    %11 = math.exp %10 : vector<8x10xf32>
    %cst_6 = arith.constant dense<0.000000e+00> : vector<8xf32>
    %12 = vector.multi_reduction <add>, %11, %cst_6 [1] : vector<8x10xf32> to vector<8xf32>
    %13 = vector.shape_cast %12 : vector<8xf32> to vector<8x1xf32>
    %14 = math.log %13 : vector<8x1xf32>
    %15 = vector.broadcast %14 : vector<8x1xf32> to vector<8x10xf32>
    %16 = arith.subf %10, %15 : vector<8x10xf32>
    %c0_7 = arith.constant 0 : index
    %c0_8 = arith.constant 0 : index
    %17 = vector.load %arg4[%c0_7, %c0_8] : memref<8x10xf32, #tpu.memory_space<vmem>>, vector<8x10xf32>
    tpu.vector_store %arg4[%c0_7, %c0_8], %16 {strides = array<i32>} : memref<8x10xf32, #tpu.memory_space<vmem>>, vector<8x10xf32>,
    return
  }
  func.func @transform_0(%arg0: i32) -> (i32, i32) {
    %c0_i32 = arith.constant 0 : i32
    %c0_i32_0 = arith.constant 0 : i32
    return %arg0, %c0_i32 : i32, i32
  }
  func.func @transform_1(%arg0: i32) -> (i32, i32) {
    %c0_i32 = arith.constant 0 : i32
    %c0_i32_0 = arith.constant 0 : i32
    %c0_i32_1 = arith.constant 0 : i32
    return %c0_i32, %c0_i32_0 : i32, i32
  }
  func.func @transform_2(%arg0: i32) -> (i32, i32) {
    %c0_i32 = arith.constant 0 : i32
    %c0_i32_0 = arith.constant 0 : i32
    %c0_i32_1 = arith.constant 0 : i32
    return %c0_i32, %c0_i32_0 : i32, i32
  }
  func.func @transform_3(%arg0: i32) -> (i32, i32) {
    %c0_i32 = arith.constant 0 : i32
    %c0_i32_0 = arith.constant 0 : i32
    return %arg0, %c0_i32 : i32, i32
  }
}

</mosaic_0001>

<bundles_post_ra>
// kernel: tpu_custom_call.1
= control target key start
LH: loop header
LB: loop body
LE: loop exit
PB: predicated region body
PF: predicated region fallthrough
CT: control target
= control target key end

     0   :  { %v824_v44 = vmov 0.0   ;;  %vm825_vm0 = vmmov 0   ;;  %s1024_s0 = inlined_call_operand.vmem [shape: f32[8,784], index: 0, kind: input, shape index: {}]   ;;  %s1025_s1 = inlined_call_operand.vmem [shape: bf16[784,10], index: 1, kind: input, shape index: {}]   ;;  %s1026_s2 = inlined_call_operand.vmem [shape: f32[1,10], index: 2, kind: input, shape index: {}]   ;;  %s1027_s3 = inlined_call_operand.hbm [shape: f32[8,10], index: 3, kind: output, shape index: {}]  }
   0x1   :  { %v749_v0 = vld [vmem:[%s1025_s1 + $0x78] sm:$0xff]   ;;  %v753_v4 = vld [vmem:[%s1025_s1 + $0x70] sm:$0xff]   ;;  %v757_v8 = vld [vmem:[%s1025_s1 + $0x68] sm:$0xff]  }
   0x2   :  { %v750_v1 = vld [vmem:[%s1025_s1 + $0x38] sm:$0xff]   ;;  %672 = vmatprep.subr.bf16.mxu0 %v749_v0  ;;  %v754_v5 = vld [vmem:[%s1025_s1 + $0x30] sm:$0xff]   ;;  %v758_v9 = vld [vmem:[%s1025_s1 + $0x28] sm:$0xff]  }
   0x3   :  { %v751_v2 = vld [vmem:[%s1025_s1 + $0xf8] sm:$0xff]   ;;  %673 = vmatpush3.bf16.msra.mxu0 %v750_v1  ;;  %v755_v6 = vld [vmem:[%s1025_s1 + $0xf0] sm:$0xff]   ;;  %v759_v10 = vld [vmem:[%s1025_s1 + $0xe8] sm:$0xff]  }
   0x4   :  { %v752_v3 = vld [vmem:[%s1025_s1 + $0xb8] sm:$0xff]   ;;  %694 = vmatprep.subr.bf16.mxu1 %v751_v2  ;;  %674 = vmatprep.subr.bf16.mxu0 %v753_v4  ;;  %v756_v7 = vld [vmem:[%s1025_s1 + $0xb0] sm:$0xff]   ;;  %v760_v11 = vld [vmem:[%s1025_s1 + $0xa8] sm:$0xff]  }
   0x5   :  { %695 = vmatpush3.bf16.msra.mxu1 %v752_v3  ;;  %v761_v12 = vld [vmem:[%s1025_s1 + $0x60] sm:$0xff]   ;;  %v765_v16 = vld [vmem:[%s1025_s1 + $0x58] sm:$0xff]   ;;  %v769_v20 = vld [vmem:[%s1025_s1 + $0x50] sm:$0xff]  }
   0x6   :  { %696 = vmatprep.subr.bf16.mxu1 %v755_v6  ;;  %v762_v13 = vld [vmem:[%s1025_s1 + $0x20] sm:$0xff]   ;;  %v766_v17 = vld [vmem:[%s1025_s1 + $0x18] sm:$0xff]   ;;  %v770_v21 = vld [vmem:[%s1025_s1 + $0x10] sm:$0xff]  }
   0x7   :  { %675 = vmatpush3.bf16.msra.mxu0 %v754_v5  ;;  %v763_v14 = vld [vmem:[%s1025_s1 + $0xe0] sm:$0xff]   ;;  %v767_v18 = vld [vmem:[%s1025_s1 + $0xd8] sm:$0xff]   ;;  %v771_v22 = vld [vmem:[%s1025_s1 + $0xd0] sm:$0xff]  }
   0x8   :  { %676 = vmatprep.subr.bf16.mxu0 %v757_v8  ;;  %v764_v15 = vld [vmem:[%s1025_s1 + $0xa0] sm:$0xff]   ;;  %v768_v19 = vld [vmem:[%s1025_s1 + $0x98] sm:$0xff]   ;;  %v772_v23 = vld [vmem:[%s1025_s1 + $0x90] sm:$0xff]  }
   0x9   :  { %697 = vmatpush3.bf16.msra.mxu1 %v756_v7  ;;  %v773_v24 = vld [vmem:[%s1025_s1 + $0x48] sm:$0xff]   ;;  %v777_v28 = vld [vmem:[%s1025_s1 + $0x40] sm:$0xff]   ;;  %v781_v36 = vld [vmem:[%s1025_s1 + $0x178] sm:$0xff]  }
   0xa   :  { %698 = vmatprep.subr.bf16.mxu1 %v759_v10  ;;  %v774_v25 = vld [vmem:[%s1025_s1 + $0x8] sm:$0xff]   ;;  %v778_v29 = vld [vmem:[%s1025_s1] sm:$0xff]   ;;  %v19_v37 = vld [vmem:[%s1024_s0 + $0x18] sm:$0xff] }
   0xb   :  { %677 = vmatpush3.bf16.msra.mxu0 %v758_v9  ;;  %v775_v26 = vld [vmem:[%s1025_s1 + $0xc8] sm:$0xff]   ;;  %v779_v30 = vld [vmem:[%s1025_s1 + $0xc0] sm:$0xff]   ;;  %v26_v38 = vpack.c.bf16 %v19_v37, %v19_v37  ;;  %v782_v39 = vld [vmem:[%s1025_s1 + $0x138] sm:$0xff]  }
   0xc   :  { %678 = vmatprep.subr.bf16.mxu0 %v761_v12  ;;  %v776_v27 = vld [vmem:[%s1025_s1 + $0x88] sm:$0xff]   ;;  %v780_v33 = vld [vmem:[%s1025_s1 + $0x80] sm:$0xff]   ;;  %v18_v40 = vld [vmem:[%s1024_s0 + $0x10] sm:$0xff] }
   0xd   :  { %699 = vmatpush3.bf16.msra.mxu1 %v760_v11  ;;  %v17_v31 = vld [vmem:[%s1024_s0 + $0x8] sm:$0xff]  ;;  %v16_v34 = vld [vmem:[%s1024_s0] sm:$0xff]  ;;  %505 = vmatprep.mubr.bf16.mxu1 %v26_v38  ;;  %v25_v41 = vpack.c.bf16 %v18_v40, %v18_v40  ;;  %v783_v42 = vld [vmem:[%s1025_s1 + $0x170] sm:$0xff]  }
   0xe   :  { %700 = vmatprep.subr.bf16.mxu1 %v763_v14  ;;  %v24_v32 = vpack.c.bf16 %v17_v31, %v17_v31  ;;  %v23_v35 = vpack.c.bf16 %v16_v34, %v16_v34  ;;  %v784_v43 = vld [vmem:[%s1025_s1 + $0x130] sm:$0xff]   ;;  %v785_v45 = vld [vmem:[%s1025_s1 + $0x168] sm:$0xff]   ;;  %v787_v47 = vld [vmem:[%s1025_s1 + $0x160] sm:$0xff]  }
   0xf   :  { %679 = vmatpush3.bf16.msra.mxu0 %v762_v13  ;;  %v786_v46 = vld [vmem:[%s1025_s1 + $0x128] sm:$0xff]   ;;  %v788_v48 = vld [vmem:[%s1025_s1 + $0x120] sm:$0xff]   ;;  %v789_v49 = vld [vmem:[%s1025_s1 + $0x158] sm:$0xff]  }
  0x10   :  { %680 = vmatprep.subr.bf16.mxu0 %v765_v16  ;;  %465 = vmatprep.mubr.bf16.mxu0 %v24_v32  ;;  %v790_v50 = vld [vmem:[%s1025_s1 + $0x118] sm:$0xff]   ;;  %v791_v51 = vld [vmem:[%s1025_s1 + $0x150] sm:$0xff]   ;;  %v797_v52 = vld [vmem:[%s1025_s1 + $0x180] sm:$0xff]  }
  0x11   :  { %701 = vmatpush3.bf16.msra.mxu1 %v764_v15  ;;  %v21_v53 = vld [vmem:[%s1024_s0 + $0x28] sm:$0xff]  ;;  %v22_v55 = vld [vmem:[%s1024_s0 + $0x30] sm:$0xff] }
  0x12   :  { %702 = vmatprep.subr.bf16.mxu1 %v767_v18  ;;  %v28_v54 = vpack.c.bf16 %v21_v53, %v21_v53 }
  0x13   :  { %681 = vmatpush3.bf16.msra.mxu0 %v766_v17 }
  0x14   :  { %682 = vmatprep.subr.bf16.mxu0 %v769_v20 }
  0x15   :  { %703 = vmatpush3.bf16.msra.mxu1 %v768_v19 }
  0x16   :  { %704 = vmatprep.subr.bf16.mxu1 %v771_v22 }
  0x17   :  { %683 = vmatpush3.bf16.msra.mxu0 %v770_v21 }
  0x18   :  { %684 = vmatprep.subr.bf16.mxu0 %v773_v24 }
  0x19   :  { %705 = vmatpush3.bf16.msra.mxu1 %v772_v23 }
  0x1a   :  { %706 = vmatprep.subr.bf16.mxu1 %v775_v26 }
  0x1b   :  { %685 = vmatpush3.bf16.msra.mxu0 %v774_v25 }
  0x1c   :  { %686 = vmatprep.subr.bf16.mxu0 %v777_v28 }
  0x1d   :  { %707 = vmatpush3.bf16.msra.mxu1 %v776_v27 }
  0x1e   :  { %708 = vmatprep.subr.bf16.mxu1 %v779_v30 }
  0x1f   :  { %687 = vmatpush3.bf16.msra.mxu0 %v778_v29 }
  0x20   :  { %716 = vmatprep.subr.bf16.mxu0 %v781_v36 }
  0x21   :  { %709 = vmatpush3.bf16.msra.mxu1 %v780_v33 }
  0x22   :  { %466 = vmatmul.mubr.bf16.vlgmr.msra.gmra.mxu0 %v23_v35  ;;  %740 = vmatprep.subr.bf16.mxu1 %v824_v44 }
  0x23   :  { %717 = vmatpush3.bf16.msra.mxu0 %v782_v39 }
  0x24   :  { %506 = vmatmul.mubr.bf16.vlgmr.msra.gmra.mxu1 %v25_v41  ;;  %718 = vmatprep.subr.bf16.mxu0 %v783_v42 }
  0x25   :  { %742 = vmatprep.mubr.msk.bf16.mxu1 %vm825_vm0, %v824_v44 }
  0x27   :  { %719 = vmatpush3.bf16.msra.mxu0 %v784_v43 }
  0x28   :  { %720 = vmatprep.subr.bf16.mxu0 %v785_v45 }
  0x2b   :  { %721 = vmatpush3.bf16.msra.mxu0 %v786_v46 }
  0x2c   :  { %722 = vmatprep.subr.bf16.mxu0 %v787_v47 }
  0x2f   :  { %723 = vmatpush3.bf16.msra.mxu0 %v788_v48 }
  0x30   :  { %724 = vmatprep.subr.bf16.mxu0 %v789_v49 }
  0x31   :  { %8 = vsyncpa [#allocation3], 0  ;;  %v792_v56 = vld [vmem:[%s1025_s1 + $0x110] sm:$0xff]   ;;  %741 = vmatpush3.bf16.msra.mxu1 %v797_v52  ;;  %v29_v57 = vpack.c.bf16 %v22_v55, %v22_v55  ;;  %vm429_vm1 = vcmask 130048   ;;  %v793_v58 = vld [vmem:[%s1025_s1 + $0x148] sm:$0xff]   ;;  %545 = vmatprep.mubr.bf16.mxu0 %v28_v54  ;;  %vm593_vm2 = vcmask 80896  }
  0x32   :  { %v794_v59 = vld [vmem:[%s1025_s1 + $0x108] sm:$0xff]   ;;  %v795_v60 = vld [vmem:[%s1025_s1 + $0x140] sm:$0xff]  }
  0x33   :  { %725 = vmatpush3.bf16.msra.mxu0 %v790_v50  ;;  %v796_v61 = vld [vmem:[%s1025_s1 + $0x100] sm:$0xff]  }
  0x34   :  { %726 = vmatprep.subr.bf16.mxu0 %v791_v51  ;;  %743 = vmatmul.mubr.msk.bf16.vlgmr.msra.gmra.mxu1 %vm429_vm1, %v29_v57  ;;  %v20_v62 = vld [vmem:[%s1024_s0 + $0x20] sm:$0xff]  ;;  %s826_s0 = smov [#allocation2]  }
  0x35   :  { %v27_v63 = vpack.c.bf16 %v20_v62, %v20_v62  ;;  %v621_v13 = vld [vmem:[%s1026_s2] ss:$0 sm:$0xff]  ;;  %s613_s2 = sshll.u32 %s826_s0, 4  ;;  %s614_s2 = int_to_ptr.vmem [resolvable:$true] %s613_s2 }
  0x36   :  { %s802_s17 = scalar_lea.vmem %s614_s2, 128  ;;  %p807_p1 = scmp.lt.s32.totalorder %s614_s2, %s614_s2 }
  0x37   :  { %727 = vmatpush3.bf16.msra.mxu0 %v792_v56  ;;  %p803_p0 = scmp.ne.s32.totalorder %s614_s2, %s802_s17  ;;  %p808_p2 = scmp.lt.s32.totalorder %s802_s17, %s802_s17 }
  0x38   :  { %728 = vmatprep.subr.bf16.mxu0 %v793_v58 }
  0x39   :  { %p809_p3 = por %p808_p2, %p807_p1 }
  0x3b   :  { %729 = vmatpush3.bf16.msra.mxu0 %v794_v59  ;;  %p810_p4 = pnand %p809_p3, %p803_p0 }
  0x3c   :  { %730 = vmatprep.subr.bf16.mxu0 %v795_v60 }
  0x3f   :  { %731 = vmatpush3.bf16.msra.mxu0 %v796_v61 }
  0x42   :  { %546 = vmatmul.mubr.bf16.vlgmr.msra.gmra.mxu0 %v27_v63 }
  0xe2   :  { %v688_v0 = vpop.f32.mrf.mxu0 }
  0xe4   :  { %v689_v1 = vpop.f32.mrf.mxu0  ;;  %v710_v2 = vpop.f32.mrf.mxu1 }
  0xe5   :  { %v690_v12 = vadd.f32 %v689_v1, %v688_v0 }
  0xe6   :  { %v691_v3 = vpop.f32.mrf.mxu0  ;;  %v711_v4 = vpop.f32.mrf.mxu1 }
  0xe7   :  { %v468_v14 = vadd.f32 %v690_v12, %v621_v13  ;;  %v712_v15 = vadd.f32 %v711_v4, %v710_v2 }
  0xe8   :  { %v692_v5 = vpop.f32.mrf.mxu0  ;;  %v713_v6 = vpop.f32.mrf.mxu1 }
  0xe9   :  { %v508_v18 = vadd.f32 %v712_v15, %v468_v14 }
  0xea   :  { %v714_v7 = vpop.f32.mrf.mxu1 }
  0xf4   :  { %v587_v8 = vpop.f32.mrf.mxu1 }
  0xf6   :  { %v744_v9 = vpop.f32.mrf.mxu1 }
  0xf8   :  { %v590_v10 = vpop.f32.mrf.mxu1 }
  0xfa   :  { %v745_v11 = vpop.f32.mrf.mxu1 }
 0x102   :  { %v732_v16 = vpop.f32.mrf.mxu0 }
 0x104   :  { %v733_v17 = vpop.f32.mrf.mxu0 }
 0x105   :  { %v734_v19 = vadd.f32 %v733_v17, %v732_v16 }
 0x106   :  { %v735_v20 = vpop.f32.mrf.mxu0 }
 0x107   :  { %v548_v21 = vadd.f32 %v734_v19, %v508_v18 }
 0x108   :  { %v736_v22 = vpop.f32.mrf.mxu0 }
 0x109   :  { %v588_v23 = vadd.f32 %v587_v8, %v548_v21 }
 0x10b   :  { %v594_v24 = vsel %vm593_vm2, %v588_v23, -inf }
 0x10c   :  { %595 = vmax.xlane.f32.xlu0 %v594_v24 }
 0x195   :  { %v596_v25 = vpop.xlane.xlu0 %595 }
 0x196   :  { %v597_v26 = vsub.f32 %v588_v23, %v596_v25 }
 0x198   :  { %v598_v27 = vmul.f32 1.442695, %v597_v26 }
 0x19a   :  { %798 = vpow2.f32 %v598_v27 }
 0x1a7   :  { %v799_v28 = vpop.eup %798 }
 0x1a8   :  { %v600_v29 = vsel %vm593_vm2, %v799_v28, 0.0 }
 0x1a9   :  { %601 = vadd.xlane.f32.xlu0 %v600_v29 }
 0x232   :  { %v602_v30 = vpop.xlane.xlu0 %601 }
 0x233   :  { %800 = vlog2.f32 %v602_v30 }
 0x240   :  { %v801_v31 = vpop.eup %800 }
 0x241   :  { %v604_v32 = vmul.f32 0.6931472, %v801_v31 }
 0x243   :  { %v605_v33 = vsub.f32 %v597_v26, %v604_v32 }
 0x245   :  { %606 = vst.msk [vmem:[#allocation2] sm:$0xff] %vm593_vm2, %v605_v33 }
 0x246   :  { %813 = shalt.err (!%p810_p4)
}
 0x247   :  { %616 = dma.vmem_to_hbm [thread:$0]  %s614_s2, 128, %s1027_s3, [#allocation3]  }
 0x248   :  { %822 = dma.done.wait [#allocation3], 128  }
 0x249   :  { %823 = vsyncadd [#allocation3], 4294967168 }
 0x24a   :  { %620 = vsyncpa [#allocation3], 1 }

</bundles_post_ra>
